<compile_context>
chip_gen: v7x
topology: tpu7x:2x2x1
jax: 0.10.0
libtpu: 0.0.40
codegen_flags: <defaults>
</compile_context>

<pallas_src>
import functools

import jax
import jax.numpy as jnp
from jax.experimental import pallas as pl
from jax.experimental.pallas import tpu as pltpu


def _encoder_layer_kernel(x_ref, w_ref, cb_ref, a_ref, b_ref, o_ref, *, eps):
    """Fused causal-conv + residual + LayerNorm epilogue for a batch chunk.

    x_ref : (bb, C, L)          input activations
    w_ref : (K, C_in, C_out, 1) conv weights, w_ref[k, j, :, 0] == weight[:, j, k]
    cb_ref: (1, C, 1)           conv bias
    a_ref : (1, 1, L)           LayerNorm scale (a_2)
    b_ref : (1, 1, L)           LayerNorm shift (b_2)
    o_ref : (bb, C, L)          output
    """
    bb, C, L = x_ref.shape
    K = w_ref.shape[0]

    x3 = x_ref[...].astype(jnp.float32)                        # (bb, C, L)

    # ---- causal left-pad inside the kernel (register/VMEM data only) ----
    xp = jnp.concatenate(
        [jnp.zeros((bb, C, K - 1), jnp.float32), x3], axis=-1)  # (bb, C, L+K-1)

    # ---- CausalConv1d as K*C broadcast-FMA VPU ops (C is tiny -> skip the MXU) ----
    wall = w_ref[...].astype(jnp.float32)                       # (K, C, C, 1), one load
    q = jnp.broadcast_to(cb_ref[...].astype(jnp.float32), (bb, C, L))  # bias-initialized acc
    for k in range(K):                                          # static unroll (K=7)
        xk = xp[:, :, k:k + L]                                  # shifted view, (bb, C, L)
        for j in range(C):                                      # static unroll over in-channels
            w_col = wall[k, j]                                  # (C_out, 1) == W[:, j, k]
            q = q + w_col[None, :, :] * xk[:, j:j + 1, :]       # (1,C,1)*(bb,1,L) -> (bb,C,L)

    # ---- SublayerOutput[0]: x = query + dropout(self_attn(query, x_in, x_in)) ----
    # TODO(synk): self_attn has no definition in the provided source; identity placeholder.
    attn_out = q
    x = q + attn_out                                            # dropout == identity (eval)
    # norm(query) of SublayerOutput[0] is discarded by the reference lambda -> skipped.

    # ---- SublayerOutput[1]: out = x + dropout(feed_forward(LayerNorm(x))) ----
    mean = jnp.mean(x, axis=-1, keepdims=True)                  # (bb, C, 1)
    diff = x - mean
    # torch.std default is the unbiased estimator (divide by N-1); eps added to std.
    var = jnp.sum(diff * diff, axis=-1, keepdims=True) * (1.0 / (L - 1))
    std = jnp.sqrt(var)
    normed = (a_ref[...].astype(jnp.float32) * (diff / (std + eps))
              + b_ref[...].astype(jnp.float32))
    # TODO(synk): feed_forward has no definition in the provided source; identity placeholder.
    ff_out = normed
    o_ref[...] = (x + ff_out).astype(o_ref.dtype)


def encoder_layer_forward(x_in, conv_w, conv_b, a_2, b_2, *, eps=1e-6,
                          batch_block=None, vmem_limit_bytes=32 * 1024 * 1024):
    """EncoderLayer.forward. x_in: (B, C, L) with C=afr_reduced_cnn_size, L=d_model."""
    B, C, L = x_in.shape
    K = conv_w.shape[-1]

    # Small parameters in kernel-friendly layouts (built once, negligible).
    w4 = jnp.transpose(conv_w, (2, 1, 0))[..., None]   # (K, C_in, C_out, 1)
    cb = conv_b.reshape(1, C, 1)
    a2 = a_2.reshape(1, 1, L)
    b2 = b_2.reshape(1, 1, L)

    # Fold as many batch elements as fit a modest VMEM budget into one grid step
    # (per-grid-step overhead ~0.35us; tiny per-batch blocks are pure overhead).
    if batch_block is None:
        padded_elem = max(C, 8) * max(L, 128) * 4       # rough padded f32 bytes / batch elem
        batch_block = max(1, min(B, (2 * 1024 * 1024) // padded_elem))
    bb = int(batch_block)
    while B % bb:                                       # keep the grid exactly divisible
        bb -= 1
    grid = (B // bb,)

    kernel = functools.partial(_encoder_layer_kernel, eps=eps)

    return pl.pallas_call(
        kernel,
        out_shape=jax.ShapeDtypeStruct((B, C, L), x_in.dtype),
        grid_spec=pltpu.PrefetchScalarGridSpec(
            num_scalar_prefetch=0,
            grid=grid,
            in_specs=[
                # Activations: pipelined batch-chunk blocks (full extent in last 2 dims).
                pl.BlockSpec((bb, C, L), lambda i: (i, 0, 0)),
                # Small parameters: whole-array VMEM residents, no per-step DMA.
                pl.BlockSpec(memory_space=pltpu.MemorySpace.VMEM),
                pl.BlockSpec(memory_space=pltpu.MemorySpace.VMEM),
                pl.BlockSpec(memory_space=pltpu.MemorySpace.VMEM),
                pl.BlockSpec(memory_space=pltpu.MemorySpace.VMEM),
            ],
            out_specs=pl.BlockSpec((bb, C, L), lambda i: (i, 0, 0)),
        ),
        compiler_params=pltpu.CompilerParams(
            dimension_semantics=("parallel",),
            vmem_limit_bytes=vmem_limit_bytes,
        ),
    )(x_in, w4, cb, a2, b2)


def _reference_forward(x_in, conv_w, conv_b, a_2, b_2, eps=1e-6):
    """Pure-JAX reference with identical placeholder semantics."""
    K = conv_w.shape[-1]
    q = jax.lax.conv_general_dilated(
        x_in, conv_w, window_strides=(1,), padding=[(K - 1, 0)],
        dimension_numbers=("NCH", "OIH", "NCH")) + conv_b[None, :, None]
    attn_out = q                                            # placeholder self_attn
    x = q + attn_out                                        # dropout = identity
    mean = jnp.mean(x, axis=-1, keepdims=True)
    std = jnp.std(x, axis=-1, keepdims=True, ddof=1)        # unbiased, like torch.std
    normed = a_2 * (x - mean) / (std + eps) + b_2
    return x + normed                                       # placeholder feed_forward


if __name__ == "__main__":
    B, C, L, K = 2, 4, 32, 7                                # C=afr_reduced_cnn_size, L=d_model
    key = jax.random.PRNGKey(0)
    kx, kw, kb = jax.random.split(key, 3)
    x_in = jax.random.normal(kx, (B, C, L), dtype=jnp.float32)
    conv_w = jax.random.normal(kw, (C, C, K), dtype=jnp.float32) * 0.2
    conv_b = jax.random.normal(kb, (C,), dtype=jnp.float32) * 0.1
    a_2 = jnp.ones((L,), dtype=jnp.float32)                 # LayerNorm.__init__: ones
    b_2 = jnp.zeros((L,), dtype=jnp.float32)                # LayerNorm.__init__: zeros

    fwd = jax.jit(encoder_layer_forward)
    out = jax.block_until_ready(fwd(x_in, conv_w, conv_b, a_2, b_2))

    ref = _reference_forward(x_in, conv_w, conv_b, a_2, b_2)
    assert out.shape == (B, C, L)
    max_err = float(jnp.max(jnp.abs(out - ref)))
    assert max_err < 1e-3, f"max abs error too large: {max_err}"
    print("KERNEL_OK")
</pallas_src>

<mosaic_0001>
module attributes {stable_mosaic.version = 11 : i64} {
  func.func @_encoder_layer_kernel(%arg0: i32, %arg1: memref<2x4x32xf32, #tpu.memory_space<vmem>>, %arg2: memref<7x4x4x1xf32, #tpu.memory_space<vmem>>, %arg3: memref<1x4x1xf32, #tpu.memory_space<vmem>>, %arg4: memref<1x1x32xf32, #tpu.memory_space<vmem>>, %arg5: memref<1x1x32xf32, #tpu.memory_space<vmem>>, %arg6: memref<2x4x32xf32, #tpu.memory_space<vmem>>) attributes {dimension_semantics = [#tpu.dimension_semantics<parallel>], iteration_bounds = array<i64: 1>, scalar_prefetch = 0 : i64, scratch_operands = 0 : i64, tpu.core_type = #tpu.core_type<tc>, window_params = [{transform_indices = @transform_0, window_bounds = array<i64: 2, 4, 32>}, {pipeline_mode = #tpu.pipeline_mode<synchronous>, transform_indices = @transform_1, window_bounds = array<i64: 7, 4, 4, 1>}, {pipeline_mode = #tpu.pipeline_mode<synchronous>, transform_indices = @transform_2, window_bounds = array<i64: 1, 4, 1>}, {pipeline_mode = #tpu.pipeline_mode<synchronous>, transform_indices = @transform_3, window_bounds = array<i64: 1, 1, 32>}, {pipeline_mode = #tpu.pipeline_mode<synchronous>, transform_indices = @transform_4, window_bounds = array<i64: 1, 1, 32>}, {transform_indices = @transform_5, window_bounds = array<i64: 2, 4, 32>}]} {
    %c0 = arith.constant 0 : index
    %c0_0 = arith.constant 0 : index
    %c0_1 = arith.constant 0 : index
    %0 = vector.load %arg1[%c0, %c0_0, %c0_1] : memref<2x4x32xf32, #tpu.memory_space<vmem>>, vector<2x4x32xf32>
    %cst = arith.constant 0.000000e+00 : f32
    %1 = vector.broadcast %cst : f32 to vector<2x4x6xf32>
    %2 = tpu.concatenate %1, %0 in 2 : vector<2x4x6xf32>, vector<2x4x32xf32> -> vector<2x4x38xf32>
    %c0_2 = arith.constant 0 : index
    %c0_3 = arith.constant 0 : index
    %c0_4 = arith.constant 0 : index
    %c0_5 = arith.constant 0 : index
    %3 = vector.load %arg2[%c0_2, %c0_3, %c0_4, %c0_5] : memref<7x4x4x1xf32, #tpu.memory_space<vmem>>, vector<7x4x4x1xf32>
    %c0_6 = arith.constant 0 : index
    %c0_7 = arith.constant 0 : index
    %c0_8 = arith.constant 0 : index
    %4 = vector.load %arg3[%c0_6, %c0_7, %c0_8] : memref<1x4x1xf32, #tpu.memory_space<vmem>>, vector<1x4x1xf32>
    %5 = vector.shape_cast %4 : vector<1x4x1xf32> to vector<1x4x1xf32>
    %6 = vector.broadcast %5 : vector<1x4x1xf32> to vector<2x4x32xf32>
    %7 = vector.extract_strided_slice %2 {offsets = [0, 0, 0], sizes = [2, 4, 32], strides = [1, 1, 1]} : vector<2x4x38xf32> to vector<2x4x32xf32>
    %8 = vector.extract_strided_slice %3 {offsets = [0, 0, 0, 0], sizes = [1, 1, 4, 1], strides = [1, 1, 1, 1]} : vector<7x4x4x1xf32> to vector<1x1x4x1xf32>
    %9 = vector.shape_cast %8 : vector<1x1x4x1xf32> to vector<4x1xf32>
    %10 = vector.shape_cast %9 : vector<4x1xf32> to vector<1x4x1xf32>
    %11 = vector.extract_strided_slice %7 {offsets = [0, 0, 0], sizes = [2, 1, 32], strides = [1, 1, 1]} : vector<2x4x32xf32> to vector<2x1x32xf32>
    %12 = vector.broadcast %10 : vector<1x4x1xf32> to vector<2x4x32xf32>
    %13 = vector.broadcast %11 : vector<2x1x32xf32> to vector<2x4x32xf32>
    %14 = arith.mulf %12, %13 : vector<2x4x32xf32>
    %15 = arith.addf %6, %14 : vector<2x4x32xf32>
    %16 = vector.extract_strided_slice %3 {offsets = [0, 1, 0, 0], sizes = [1, 1, 4, 1], strides = [1, 1, 1, 1]} : vector<7x4x4x1xf32> to vector<1x1x4x1xf32>
    %17 = vector.shape_cast %16 : vector<1x1x4x1xf32> to vector<4x1xf32>
    %18 = vector.shape_cast %17 : vector<4x1xf32> to vector<1x4x1xf32>
    %19 = vector.extract_strided_slice %7 {offsets = [0, 1, 0], sizes = [2, 1, 32], strides = [1, 1, 1]} : vector<2x4x32xf32> to vector<2x1x32xf32>
    %20 = vector.broadcast %18 : vector<1x4x1xf32> to vector<2x4x32xf32>
    %21 = vector.broadcast %19 : vector<2x1x32xf32> to vector<2x4x32xf32>
    %22 = arith.mulf %20, %21 : vector<2x4x32xf32>
    %23 = arith.addf %15, %22 : vector<2x4x32xf32>
    %24 = vector.extract_strided_slice %3 {offsets = [0, 2, 0, 0], sizes = [1, 1, 4, 1], strides = [1, 1, 1, 1]} : vector<7x4x4x1xf32> to vector<1x1x4x1xf32>
    %25 = vector.shape_cast %24 : vector<1x1x4x1xf32> to vector<4x1xf32>
    %26 = vector.shape_cast %25 : vector<4x1xf32> to vector<1x4x1xf32>
    %27 = vector.extract_strided_slice %7 {offsets = [0, 2, 0], sizes = [2, 1, 32], strides = [1, 1, 1]} : vector<2x4x32xf32> to vector<2x1x32xf32>
    %28 = vector.broadcast %26 : vector<1x4x1xf32> to vector<2x4x32xf32>
    %29 = vector.broadcast %27 : vector<2x1x32xf32> to vector<2x4x32xf32>
    %30 = arith.mulf %28, %29 : vector<2x4x32xf32>
    %31 = arith.addf %23, %30 : vector<2x4x32xf32>
    %32 = vector.extract_strided_slice %3 {offsets = [0, 3, 0, 0], sizes = [1, 1, 4, 1], strides = [1, 1, 1, 1]} : vector<7x4x4x1xf32> to vector<1x1x4x1xf32>
    %33 = vector.shape_cast %32 : vector<1x1x4x1xf32> to vector<4x1xf32>
    %34 = vector.shape_cast %33 : vector<4x1xf32> to vector<1x4x1xf32>
    %35 = vector.extract_strided_slice %7 {offsets = [0, 3, 0], sizes = [2, 1, 32], strides = [1, 1, 1]} : vector<2x4x32xf32> to vector<2x1x32xf32>
    %36 = vector.broadcast %34 : vector<1x4x1xf32> to vector<2x4x32xf32>
    %37 = vector.broadcast %35 : vector<2x1x32xf32> to vector<2x4x32xf32>
    %38 = arith.mulf %36, %37 : vector<2x4x32xf32>
    %39 = arith.addf %31, %38 : vector<2x4x32xf32>
    %40 = vector.extract_strided_slice %2 {offsets = [0, 0, 1], sizes = [2, 4, 32], strides = [1, 1, 1]} : vector<2x4x38xf32> to vector<2x4x32xf32>
    %41 = vector.extract_strided_slice %3 {offsets = [1, 0, 0, 0], sizes = [1, 1, 4, 1], strides = [1, 1, 1, 1]} : vector<7x4x4x1xf32> to vector<1x1x4x1xf32>
    %42 = vector.shape_cast %41 : vector<1x1x4x1xf32> to vector<4x1xf32>
    %43 = vector.shape_cast %42 : vector<4x1xf32> to vector<1x4x1xf32>
    %44 = vector.extract_strided_slice %40 {offsets = [0, 0, 0], sizes = [2, 1, 32], strides = [1, 1, 1]} : vector<2x4x32xf32> to vector<2x1x32xf32>
    %45 = vector.broadcast %43 : vector<1x4x1xf32> to vector<2x4x32xf32>
    %46 = vector.broadcast %44 : vector<2x1x32xf32> to vector<2x4x32xf32>
    %47 = arith.mulf %45, %46 : vector<2x4x32xf32>
    %48 = arith.addf %39, %47 : vector<2x4x32xf32>
    %49 = vector.extract_strided_slice %3 {offsets = [1, 1, 0, 0], sizes = [1, 1, 4, 1], strides = [1, 1, 1, 1]} : vector<7x4x4x1xf32> to vector<1x1x4x1xf32>
    %50 = vector.shape_cast %49 : vector<1x1x4x1xf32> to vector<4x1xf32>
    %51 = vector.shape_cast %50 : vector<4x1xf32> to vector<1x4x1xf32>
    %52 = vector.extract_strided_slice %40 {offsets = [0, 1, 0], sizes = [2, 1, 32], strides = [1, 1, 1]} : vector<2x4x32xf32> to vector<2x1x32xf32>
    %53 = vector.broadcast %51 : vector<1x4x1xf32> to vector<2x4x32xf32>
    %54 = vector.broadcast %52 : vector<2x1x32xf32> to vector<2x4x32xf32>
    %55 = arith.mulf %53, %54 : vector<2x4x32xf32>
    %56 = arith.addf %48, %55 : vector<2x4x32xf32>
    %57 = vector.extract_strided_slice %3 {offsets = [1, 2, 0, 0], sizes = [1, 1, 4, 1], strides = [1, 1, 1, 1]} : vector<7x4x4x1xf32> to vector<1x1x4x1xf32>
    %58 = vector.shape_cast %57 : vector<1x1x4x1xf32> to vector<4x1xf32>
    %59 = vector.shape_cast %58 : vector<4x1xf32> to vector<1x4x1xf32>
    %60 = vector.extract_strided_slice %40 {offsets = [0, 2, 0], sizes = [2, 1, 32], strides = [1, 1, 1]} : vector<2x4x32xf32> to vector<2x1x32xf32>
    %61 = vector.broadcast %59 : vector<1x4x1xf32> to vector<2x4x32xf32>
    %62 = vector.broadcast %60 : vector<2x1x32xf32> to vector<2x4x32xf32>
    %63 = arith.mulf %61, %62 : vector<2x4x32xf32>
    %64 = arith.addf %56, %63 : vector<2x4x32xf32>
    %65 = vector.extract_strided_slice %3 {offsets = [1, 3, 0, 0], sizes = [1, 1, 4, 1], strides = [1, 1, 1, 1]} : vector<7x4x4x1xf32> to vector<1x1x4x1xf32>
    %66 = vector.shape_cast %65 : vector<1x1x4x1xf32> to vector<4x1xf32>
    %67 = vector.shape_cast %66 : vector<4x1xf32> to vector<1x4x1xf32>
    %68 = vector.extract_strided_slice %40 {offsets = [0, 3, 0], sizes = [2, 1, 32], strides = [1, 1, 1]} : vector<2x4x32xf32> to vector<2x1x32xf32>
    %69 = vector.broadcast %67 : vector<1x4x1xf32> to vector<2x4x32xf32>
    %70 = vector.broadcast %68 : vector<2x1x32xf32> to vector<2x4x32xf32>
    %71 = arith.mulf %69, %70 : vector<2x4x32xf32>
    %72 = arith.addf %64, %71 : vector<2x4x32xf32>
    %73 = vector.extract_strided_slice %2 {offsets = [0, 0, 2], sizes = [2, 4, 32], strides = [1, 1, 1]} : vector<2x4x38xf32> to vector<2x4x32xf32>
    %74 = vector.extract_strided_slice %3 {offsets = [2, 0, 0, 0], sizes = [1, 1, 4, 1], strides = [1, 1, 1, 1]} : vector<7x4x4x1xf32> to vector<1x1x4x1xf32>
    %75 = vector.shape_cast %74 : vector<1x1x4x1xf32> to vector<4x1xf32>
    %76 = vector.shape_cast %75 : vector<4x1xf32> to vector<1x4x1xf32>
    %77 = vector.extract_strided_slice %73 {offsets = [0, 0, 0], sizes = [2, 1, 32], strides = [1, 1, 1]} : vector<2x4x32xf32> to vector<2x1x32xf32>
    %78 = vector.broadcast %76 : vector<1x4x1xf32> to vector<2x4x32xf32>
    %79 = vector.broadcast %77 : vector<2x1x32xf32> to vector<2x4x32xf32>
    %80 = arith.mulf %78, %79 : vector<2x4x32xf32>
    %81 = arith.addf %72, %80 : vector<2x4x32xf32>
    %82 = vector.extract_strided_slice %3 {offsets = [2, 1, 0, 0], sizes = [1, 1, 4, 1], strides = [1, 1, 1, 1]} : vector<7x4x4x1xf32> to vector<1x1x4x1xf32>
    %83 = vector.shape_cast %82 : vector<1x1x4x1xf32> to vector<4x1xf32>
    %84 = vector.shape_cast %83 : vector<4x1xf32> to vector<1x4x1xf32>
    %85 = vector.extract_strided_slice %73 {offsets = [0, 1, 0], sizes = [2, 1, 32], strides = [1, 1, 1]} : vector<2x4x32xf32> to vector<2x1x32xf32>
    %86 = vector.broadcast %84 : vector<1x4x1xf32> to vector<2x4x32xf32>
    %87 = vector.broadcast %85 : vector<2x1x32xf32> to vector<2x4x32xf32>
    %88 = arith.mulf %86, %87 : vector<2x4x32xf32>
    %89 = arith.addf %81, %88 : vector<2x4x32xf32>
    %90 = vector.extract_strided_slice %3 {offsets = [2, 2, 0, 0], sizes = [1, 1, 4, 1], strides = [1, 1, 1, 1]} : vector<7x4x4x1xf32> to vector<1x1x4x1xf32>
    %91 = vector.shape_cast %90 : vector<1x1x4x1xf32> to vector<4x1xf32>
    %92 = vector.shape_cast %91 : vector<4x1xf32> to vector<1x4x1xf32>
    %93 = vector.extract_strided_slice %73 {offsets = [0, 2, 0], sizes = [2, 1, 32], strides = [1, 1, 1]} : vector<2x4x32xf32> to vector<2x1x32xf32>
    %94 = vector.broadcast %92 : vector<1x4x1xf32> to vector<2x4x32xf32>
    %95 = vector.broadcast %93 : vector<2x1x32xf32> to vector<2x4x32xf32>
    %96 = arith.mulf %94, %95 : vector<2x4x32xf32>
    %97 = arith.addf %89, %96 : vector<2x4x32xf32>
    %98 = vector.extract_strided_slice %3 {offsets = [2, 3, 0, 0], sizes = [1, 1, 4, 1], strides = [1, 1, 1, 1]} : vector<7x4x4x1xf32> to vector<1x1x4x1xf32>
    %99 = vector.shape_cast %98 : vector<1x1x4x1xf32> to vector<4x1xf32>
    %100 = vector.shape_cast %99 : vector<4x1xf32> to vector<1x4x1xf32>
    %101 = vector.extract_strided_slice %73 {offsets = [0, 3, 0], sizes = [2, 1, 32], strides = [1, 1, 1]} : vector<2x4x32xf32> to vector<2x1x32xf32>
    %102 = vector.broadcast %100 : vector<1x4x1xf32> to vector<2x4x32xf32>
    %103 = vector.broadcast %101 : vector<2x1x32xf32> to vector<2x4x32xf32>
    %104 = arith.mulf %102, %103 : vector<2x4x32xf32>
    %105 = arith.addf %97, %104 : vector<2x4x32xf32>
    %106 = vector.extract_strided_slice %2 {offsets = [0, 0, 3], sizes = [2, 4, 32], strides = [1, 1, 1]} : vector<2x4x38xf32> to vector<2x4x32xf32>
    %107 = vector.extract_strided_slice %3 {offsets = [3, 0, 0, 0], sizes = [1, 1, 4, 1], strides = [1, 1, 1, 1]} : vector<7x4x4x1xf32> to vector<1x1x4x1xf32>
    %108 = vector.shape_cast %107 : vector<1x1x4x1xf32> to vector<4x1xf32>
    %109 = vector.shape_cast %108 : vector<4x1xf32> to vector<1x4x1xf32>
    %110 = vector.extract_strided_slice %106 {offsets = [0, 0, 0], sizes = [2, 1, 32], strides = [1, 1, 1]} : vector<2x4x32xf32> to vector<2x1x32xf32>
    %111 = vector.broadcast %109 : vector<1x4x1xf32> to vector<2x4x32xf32>
    %112 = vector.broadcast %110 : vector<2x1x32xf32> to vector<2x4x32xf32>
    %113 = arith.mulf %111, %112 : vector<2x4x32xf32>
    %114 = arith.addf %105, %113 : vector<2x4x32xf32>
    %115 = vector.extract_strided_slice %3 {offsets = [3, 1, 0, 0], sizes = [1, 1, 4, 1], strides = [1, 1, 1, 1]} : vector<7x4x4x1xf32> to vector<1x1x4x1xf32>
    %116 = vector.shape_cast %115 : vector<1x1x4x1xf32> to vector<4x1xf32>
    %117 = vector.shape_cast %116 : vector<4x1xf32> to vector<1x4x1xf32>
    %118 = vector.extract_strided_slice %106 {offsets = [0, 1, 0], sizes = [2, 1, 32], strides = [1, 1, 1]} : vector<2x4x32xf32> to vector<2x1x32xf32>
    %119 = vector.broadcast %117 : vector<1x4x1xf32> to vector<2x4x32xf32>
    %120 = vector.broadcast %118 : vector<2x1x32xf32> to vector<2x4x32xf32>
    %121 = arith.mulf %119, %120 : vector<2x4x32xf32>
    %122 = arith.addf %114, %121 : vector<2x4x32xf32>
    %123 = vector.extract_strided_slice %3 {offsets = [3, 2, 0, 0], sizes = [1, 1, 4, 1], strides = [1, 1, 1, 1]} : vector<7x4x4x1xf32> to vector<1x1x4x1xf32>
    %124 = vector.shape_cast %123 : vector<1x1x4x1xf32> to vector<4x1xf32>
    %125 = vector.shape_cast %124 : vector<4x1xf32> to vector<1x4x1xf32>
    %126 = vector.extract_strided_slice %106 {offsets = [0, 2, 0], sizes = [2, 1, 32], strides = [1, 1, 1]} : vector<2x4x32xf32> to vector<2x1x32xf32>
    %127 = vector.broadcast %125 : vector<1x4x1xf32> to vector<2x4x32xf32>
    %128 = vector.broadcast %126 : vector<2x1x32xf32> to vector<2x4x32xf32>
    %129 = arith.mulf %127, %128 : vector<2x4x32xf32>
    %130 = arith.addf %122, %129 : vector<2x4x32xf32>
    %131 = vector.extract_strided_slice %3 {offsets = [3, 3, 0, 0], sizes = [1, 1, 4, 1], strides = [1, 1, 1, 1]} : vector<7x4x4x1xf32> to vector<1x1x4x1xf32>
    %132 = vector.shape_cast %131 : vector<1x1x4x1xf32> to vector<4x1xf32>
    %133 = vector.shape_cast %132 : vector<4x1xf32> to vector<1x4x1xf32>
    %134 = vector.extract_strided_slice %106 {offsets = [0, 3, 0], sizes = [2, 1, 32], strides = [1, 1, 1]} : vector<2x4x32xf32> to vector<2x1x32xf32>
    %135 = vector.broadcast %133 : vector<1x4x1xf32> to vector<2x4x32xf32>
    %136 = vector.broadcast %134 : vector<2x1x32xf32> to vector<2x4x32xf32>
    %137 = arith.mulf %135, %136 : vector<2x4x32xf32>
    %138 = arith.addf %130, %137 : vector<2x4x32xf32>
    %139 = vector.extract_strided_slice %2 {offsets = [0, 0, 4], sizes = [2, 4, 32], strides = [1, 1, 1]} : vector<2x4x38xf32> to vector<2x4x32xf32>
    %140 = vector.extract_strided_slice %3 {offsets = [4, 0, 0, 0], sizes = [1, 1, 4, 1], strides = [1, 1, 1, 1]} : vector<7x4x4x1xf32> to vector<1x1x4x1xf32>
    %141 = vector.shape_cast %140 : vector<1x1x4x1xf32> to vector<4x1xf32>
    %142 = vector.shape_cast %141 : vector<4x1xf32> to vector<1x4x1xf32>
    %143 = vector.extract_strided_slice %139 {offsets = [0, 0, 0], sizes = [2, 1, 32], strides = [1, 1, 1]} : vector<2x4x32xf32> to vector<2x1x32xf32>
    %144 = vector.broadcast %142 : vector<1x4x1xf32> to vector<2x4x32xf32>
    %145 = vector.broadcast %143 : vector<2x1x32xf32> to vector<2x4x32xf32>
    %146 = arith.mulf %144, %145 : vector<2x4x32xf32>
    %147 = arith.addf %138, %146 : vector<2x4x32xf32>
    %148 = vector.extract_strided_slice %3 {offsets = [4, 1, 0, 0], sizes = [1, 1, 4, 1], strides = [1, 1, 1, 1]} : vector<7x4x4x1xf32> to vector<1x1x4x1xf32>
    %149 = vector.shape_cast %148 : vector<1x1x4x1xf32> to vector<4x1xf32>
    %150 = vector.shape_cast %149 : vector<4x1xf32> to vector<1x4x1xf32>
    %151 = vector.extract_strided_slice %139 {offsets = [0, 1, 0], sizes = [2, 1, 32], strides = [1, 1, 1]} : vector<2x4x32xf32> to vector<2x1x32xf32>
    %152 = vector.broadcast %150 : vector<1x4x1xf32> to vector<2x4x32xf32>
    %153 = vector.broadcast %151 : vector<2x1x32xf32> to vector<2x4x32xf32>
    %154 = arith.mulf %152, %153 : vector<2x4x32xf32>
    %155 = arith.addf %147, %154 : vector<2x4x32xf32>
    %156 = vector.extract_strided_slice %3 {offsets = [4, 2, 0, 0], sizes = [1, 1, 4, 1], strides = [1, 1, 1, 1]} : vector<7x4x4x1xf32> to vector<1x1x4x1xf32>
    %157 = vector.shape_cast %156 : vector<1x1x4x1xf32> to vector<4x1xf32>
    %158 = vector.shape_cast %157 : vector<4x1xf32> to vector<1x4x1xf32>
    %159 = vector.extract_strided_slice %139 {offsets = [0, 2, 0], sizes = [2, 1, 32], strides = [1, 1, 1]} : vector<2x4x32xf32> to vector<2x1x32xf32>
    %160 = vector.broadcast %158 : vector<1x4x1xf32> to vector<2x4x32xf32>
    %161 = vector.broadcast %159 : vector<2x1x32xf32> to vector<2x4x32xf32>
    %162 = arith.mulf %160, %161 : vector<2x4x32xf32>
    %163 = arith.addf %155, %162 : vector<2x4x32xf32>
    %164 = vector.extract_strided_slice %3 {offsets = [4, 3, 0, 0], sizes = [1, 1, 4, 1], strides = [1, 1, 1, 1]} : vector<7x4x4x1xf32> to vector<1x1x4x1xf32>
    %165 = vector.shape_cast %164 : vector<1x1x4x1xf32> to vector<4x1xf32>
    %166 = vector.shape_cast %165 : vector<4x1xf32> to vector<1x4x1xf32>
    %167 = vector.extract_strided_slice %139 {offsets = [0, 3, 0], sizes = [2, 1, 32], strides = [1, 1, 1]} : vector<2x4x32xf32> to vector<2x1x32xf32>
    %168 = vector.broadcast %166 : vector<1x4x1xf32> to vector<2x4x32xf32>
    %169 = vector.broadcast %167 : vector<2x1x32xf32> to vector<2x4x32xf32>
    %170 = arith.mulf %168, %169 : vector<2x4x32xf32>
    %171 = arith.addf %163, %170 : vector<2x4x32xf32>
    %172 = vector.extract_strided_slice %2 {offsets = [0, 0, 5], sizes = [2, 4, 32], strides = [1, 1, 1]} : vector<2x4x38xf32> to vector<2x4x32xf32>
    %173 = vector.extract_strided_slice %3 {offsets = [5, 0, 0, 0], sizes = [1, 1, 4, 1], strides = [1, 1, 1, 1]} : vector<7x4x4x1xf32> to vector<1x1x4x1xf32>
    %174 = vector.shape_cast %173 : vector<1x1x4x1xf32> to vector<4x1xf32>
    %175 = vector.shape_cast %174 : vector<4x1xf32> to vector<1x4x1xf32>
    %176 = vector.extract_strided_slice %172 {offsets = [0, 0, 0], sizes = [2, 1, 32], strides = [1, 1, 1]} : vector<2x4x32xf32> to vector<2x1x32xf32>
    %177 = vector.broadcast %175 : vector<1x4x1xf32> to vector<2x4x32xf32>
    %178 = vector.broadcast %176 : vector<2x1x32xf32> to vector<2x4x32xf32>
    %179 = arith.mulf %177, %178 : vector<2x4x32xf32>
    %180 = arith.addf %171, %179 : vector<2x4x32xf32>
    %181 = vector.extract_strided_slice %3 {offsets = [5, 1, 0, 0], sizes = [1, 1, 4, 1], strides = [1, 1, 1, 1]} : vector<7x4x4x1xf32> to vector<1x1x4x1xf32>
    %182 = vector.shape_cast %181 : vector<1x1x4x1xf32> to vector<4x1xf32>
    %183 = vector.shape_cast %182 : vector<4x1xf32> to vector<1x4x1xf32>
    %184 = vector.extract_strided_slice %172 {offsets = [0, 1, 0], sizes = [2, 1, 32], strides = [1, 1, 1]} : vector<2x4x32xf32> to vector<2x1x32xf32>
    %185 = vector.broadcast %183 : vector<1x4x1xf32> to vector<2x4x32xf32>
    %186 = vector.broadcast %184 : vector<2x1x32xf32> to vector<2x4x32xf32>
    %187 = arith.mulf %185, %186 : vector<2x4x32xf32>
    %188 = arith.addf %180, %187 : vector<2x4x32xf32>
    %189 = vector.extract_strided_slice %3 {offsets = [5, 2, 0, 0], sizes = [1, 1, 4, 1], strides = [1, 1, 1, 1]} : vector<7x4x4x1xf32> to vector<1x1x4x1xf32>
    %190 = vector.shape_cast %189 : vector<1x1x4x1xf32> to vector<4x1xf32>
    %191 = vector.shape_cast %190 : vector<4x1xf32> to vector<1x4x1xf32>
    %192 = vector.extract_strided_slice %172 {offsets = [0, 2, 0], sizes = [2, 1, 32], strides = [1, 1, 1]} : vector<2x4x32xf32> to vector<2x1x32xf32>
    %193 = vector.broadcast %191 : vector<1x4x1xf32> to vector<2x4x32xf32>
    %194 = vector.broadcast %192 : vector<2x1x32xf32> to vector<2x4x32xf32>
    %195 = arith.mulf %193, %194 : vector<2x4x32xf32>
    %196 = arith.addf %188, %195 : vector<2x4x32xf32>
    %197 = vector.extract_strided_slice %3 {offsets = [5, 3, 0, 0], sizes = [1, 1, 4, 1], strides = [1, 1, 1, 1]} : vector<7x4x4x1xf32> to vector<1x1x4x1xf32>
    %198 = vector.shape_cast %197 : vector<1x1x4x1xf32> to vector<4x1xf32>
    %199 = vector.shape_cast %198 : vector<4x1xf32> to vector<1x4x1xf32>
    %200 = vector.extract_strided_slice %172 {offsets = [0, 3, 0], sizes = [2, 1, 32], strides = [1, 1, 1]} : vector<2x4x32xf32> to vector<2x1x32xf32>
    %201 = vector.broadcast %199 : vector<1x4x1xf32> to vector<2x4x32xf32>
    %202 = vector.broadcast %200 : vector<2x1x32xf32> to vector<2x4x32xf32>
    %203 = arith.mulf %201, %202 : vector<2x4x32xf32>
    %204 = arith.addf %196, %203 : vector<2x4x32xf32>
    %205 = vector.extract_strided_slice %2 {offsets = [0, 0, 6], sizes = [2, 4, 32], strides = [1, 1, 1]} : vector<2x4x38xf32> to vector<2x4x32xf32>
    %206 = vector.extract_strided_slice %3 {offsets = [6, 0, 0, 0], sizes = [1, 1, 4, 1], strides = [1, 1, 1, 1]} : vector<7x4x4x1xf32> to vector<1x1x4x1xf32>
    %207 = vector.shape_cast %206 : vector<1x1x4x1xf32> to vector<4x1xf32>
    %208 = vector.shape_cast %207 : vector<4x1xf32> to vector<1x4x1xf32>
    %209 = vector.extract_strided_slice %205 {offsets = [0, 0, 0], sizes = [2, 1, 32], strides = [1, 1, 1]} : vector<2x4x32xf32> to vector<2x1x32xf32>
    %210 = vector.broadcast %208 : vector<1x4x1xf32> to vector<2x4x32xf32>
    %211 = vector.broadcast %209 : vector<2x1x32xf32> to vector<2x4x32xf32>
    %212 = arith.mulf %210, %211 : vector<2x4x32xf32>
    %213 = arith.addf %204, %212 : vector<2x4x32xf32>
    %214 = vector.extract_strided_slice %3 {offsets = [6, 1, 0, 0], sizes = [1, 1, 4, 1], strides = [1, 1, 1, 1]} : vector<7x4x4x1xf32> to vector<1x1x4x1xf32>
    %215 = vector.shape_cast %214 : vector<1x1x4x1xf32> to vector<4x1xf32>
    %216 = vector.shape_cast %215 : vector<4x1xf32> to vector<1x4x1xf32>
    %217 = vector.extract_strided_slice %205 {offsets = [0, 1, 0], sizes = [2, 1, 32], strides = [1, 1, 1]} : vector<2x4x32xf32> to vector<2x1x32xf32>
    %218 = vector.broadcast %216 : vector<1x4x1xf32> to vector<2x4x32xf32>
    %219 = vector.broadcast %217 : vector<2x1x32xf32> to vector<2x4x32xf32>
    %220 = arith.mulf %218, %219 : vector<2x4x32xf32>
    %221 = arith.addf %213, %220 : vector<2x4x32xf32>
    %222 = vector.extract_strided_slice %3 {offsets = [6, 2, 0, 0], sizes = [1, 1, 4, 1], strides = [1, 1, 1, 1]} : vector<7x4x4x1xf32> to vector<1x1x4x1xf32>
    %223 = vector.shape_cast %222 : vector<1x1x4x1xf32> to vector<4x1xf32>
    %224 = vector.shape_cast %223 : vector<4x1xf32> to vector<1x4x1xf32>
    %225 = vector.extract_strided_slice %205 {offsets = [0, 2, 0], sizes = [2, 1, 32], strides = [1, 1, 1]} : vector<2x4x32xf32> to vector<2x1x32xf32>
    %226 = vector.broadcast %224 : vector<1x4x1xf32> to vector<2x4x32xf32>
    %227 = vector.broadcast %225 : vector<2x1x32xf32> to vector<2x4x32xf32>
    %228 = arith.mulf %226, %227 : vector<2x4x32xf32>
    %229 = arith.addf %221, %228 : vector<2x4x32xf32>
    %230 = vector.extract_strided_slice %3 {offsets = [6, 3, 0, 0], sizes = [1, 1, 4, 1], strides = [1, 1, 1, 1]} : vector<7x4x4x1xf32> to vector<1x1x4x1xf32>
    %231 = vector.shape_cast %230 : vector<1x1x4x1xf32> to vector<4x1xf32>
    %232 = vector.shape_cast %231 : vector<4x1xf32> to vector<1x4x1xf32>
    %233 = vector.extract_strided_slice %205 {offsets = [0, 3, 0], sizes = [2, 1, 32], strides = [1, 1, 1]} : vector<2x4x32xf32> to vector<2x1x32xf32>
    %234 = vector.broadcast %232 : vector<1x4x1xf32> to vector<2x4x32xf32>
    %235 = vector.broadcast %233 : vector<2x1x32xf32> to vector<2x4x32xf32>
    %236 = arith.mulf %234, %235 : vector<2x4x32xf32>
    %237 = arith.addf %229, %236 : vector<2x4x32xf32>
    %238 = arith.addf %237, %237 : vector<2x4x32xf32>
    %cst_9 = arith.constant dense<0.000000e+00> : vector<2x4xf32>
    %239 = vector.multi_reduction <add>, %238, %cst_9 [2] : vector<2x4x32xf32> to vector<2x4xf32>
    %240 = vector.shape_cast %239 : vector<2x4xf32> to vector<2x4x1xf32>
    %cst_10 = arith.constant 3.200000e+01 : f32
    %241 = vector.broadcast %cst_10 : f32 to vector<2x4x1xf32>
    %242 = arith.divf %240, %241 : vector<2x4x1xf32>
    %243 = vector.broadcast %242 : vector<2x4x1xf32> to vector<2x4x32xf32>
    %244 = arith.subf %238, %243 : vector<2x4x32xf32>
    %245 = arith.mulf %244, %244 : vector<2x4x32xf32>
    %cst_11 = arith.constant dense<0.000000e+00> : vector<2x4xf32>
    %246 = vector.multi_reduction <add>, %245, %cst_11 [2] : vector<2x4x32xf32> to vector<2x4xf32>
    %247 = vector.shape_cast %246 : vector<2x4xf32> to vector<2x4x1xf32>
    %cst_12 = arith.constant 0.0322580636 : f32
    %248 = vector.broadcast %cst_12 : f32 to vector<2x4x1xf32>
    %249 = arith.mulf %247, %248 : vector<2x4x1xf32>
    %250 = math.sqrt %249 : vector<2x4x1xf32>
    %c0_13 = arith.constant 0 : index
    %c0_14 = arith.constant 0 : index
    %c0_15 = arith.constant 0 : index
    %251 = vector.load %arg4[%c0_13, %c0_14, %c0_15] : memref<1x1x32xf32, #tpu.memory_space<vmem>>, vector<1x1x32xf32>
    %cst_16 = arith.constant 9.99999997E-7 : f32
    %252 = vector.broadcast %cst_16 : f32 to vector<2x4x1xf32>
    %253 = arith.addf %250, %252 : vector<2x4x1xf32>
    %254 = vector.broadcast %253 : vector<2x4x1xf32> to vector<2x4x32xf32>
    %255 = arith.divf %244, %254 : vector<2x4x32xf32>
    %256 = vector.broadcast %251 : vector<1x1x32xf32> to vector<2x4x32xf32>
    %257 = arith.mulf %256, %255 : vector<2x4x32xf32>
    %c0_17 = arith.constant 0 : index
    %c0_18 = arith.constant 0 : index
    %c0_19 = arith.constant 0 : index
    %258 = vector.load %arg5[%c0_17, %c0_18, %c0_19] : memref<1x1x32xf32, #tpu.memory_space<vmem>>, vector<1x1x32xf32>
    %259 = vector.broadcast %258 : vector<1x1x32xf32> to vector<2x4x32xf32>
    %260 = arith.addf %257, %259 : vector<2x4x32xf32>
    %261 = arith.addf %238, %260 : vector<2x4x32xf32>
    %c0_20 = arith.constant 0 : index
    %c0_21 = arith.constant 0 : index
    %c0_22 = arith.constant 0 : index
    %262 = vector.load %arg6[%c0_20, %c0_21, %c0_22] : memref<2x4x32xf32, #tpu.memory_space<vmem>>, vector<2x4x32xf32>
    tpu.vector_store %arg6[%c0_20, %c0_21, %c0_22], %261 {strides = array<i32>} : memref<2x4x32xf32, #tpu.memory_space<vmem>>, vector<2x4x32xf32>,
    return
  }
  func.func @transform_0(%arg0: i32) -> (i32, i32, i32) {
    %c0_i32 = arith.constant 0 : i32
    %c0_i32_0 = arith.constant 0 : i32
    %c0_i32_1 = arith.constant 0 : i32
    return %arg0, %c0_i32, %c0_i32_0 : i32, i32, i32
  }
  func.func @transform_1(%arg0: i32) -> (i32, i32, i32, i32) {
    %c0_i32 = arith.constant 0 : i32
    %c0_i32_0 = arith.constant 0 : i32
    %c0_i32_1 = arith.constant 0 : i32
    %c0_i32_2 = arith.constant 0 : i32
    %c0_i32_3 = arith.constant 0 : i32
    return %c0_i32, %c0_i32_0, %c0_i32_1, %c0_i32_2 : i32, i32, i32, i32
  }
  func.func @transform_2(%arg0: i32) -> (i32, i32, i32) {
    %c0_i32 = arith.constant 0 : i32
    %c0_i32_0 = arith.constant 0 : i32
    %c0_i32_1 = arith.constant 0 : i32
    %c0_i32_2 = arith.constant 0 : i32
    return %c0_i32, %c0_i32_0, %c0_i32_1 : i32, i32, i32
  }
  func.func @transform_3(%arg0: i32) -> (i32, i32, i32) {
    %c0_i32 = arith.constant 0 : i32
    %c0_i32_0 = arith.constant 0 : i32
    %c0_i32_1 = arith.constant 0 : i32
    %c0_i32_2 = arith.constant 0 : i32
    return %c0_i32, %c0_i32_0, %c0_i32_1 : i32, i32, i32
  }
  func.func @transform_4(%arg0: i32) -> (i32, i32, i32) {
    %c0_i32 = arith.constant 0 : i32
    %c0_i32_0 = arith.constant 0 : i32
    %c0_i32_1 = arith.constant 0 : i32
    %c0_i32_2 = arith.constant 0 : i32
    return %c0_i32, %c0_i32_0, %c0_i32_1 : i32, i32, i32
  }
  func.func @transform_5(%arg0: i32) -> (i32, i32, i32) {
    %c0_i32 = arith.constant 0 : i32
    %c0_i32_0 = arith.constant 0 : i32
    %c0_i32_1 = arith.constant 0 : i32
    return %arg0, %c0_i32, %c0_i32_0 : i32, i32, i32
  }
}

</mosaic_0001>

<bundles_post_ra>
// kernel: encoder_layer_forward.1
= control target key start
LH: loop header
LB: loop body
LE: loop exit
PB: predicated region body
PF: predicated region fallthrough
CT: control target
= control target key end

     0   :  { %v673_v2 = vmov 0   ;;  %s674_s22 = smov 6   ;;  %s935_s0 = inlined_call_operand.vmem [shape: f32[2,4,32], index: 0, kind: input, shape index: {}]   ;;  %s936_s1 = inlined_call_operand.vmem [shape: f32[7,4,4,1], index: 1, kind: input, shape index: {}]   ;;  %s937_s2 = inlined_call_operand.vmem [shape: f32[1,4,1], index: 2, kind: input, shape index: {}]   ;;  %s938_s3 = inlined_call_operand.vmem [shape: f32[1,1,32], index: 3, kind: input, shape index: {}]   ;;  %s939_s4 = inlined_call_operand.vmem [shape: f32[1,1,32], index: 4, kind: input, shape index: {}]   ;;  %s940_s5 = inlined_call_operand.hbm [shape: f32[2,4,32], index: 5, kind: output, shape index: {}]  }
   0x1   :  { %v21_v0 = vld [vmem:[%s935_s0] sm:$0xf]  ;;  %v38_v1 = vld [vmem:[%s936_s1 + $0x10] sm:$0xf]  ;;  %639 = vset.pattern.permute.xlu0 %v673_v2  ;;  %v22_v3 = vld [vmem:[%s935_s0 + $0x4] sm:$0xf]  ;;  %640 = vset.pattern.permute.xlu1 %v673_v2 }
   0x2   :  { %25 = vrot.lane.b32.xlu1 %v21_v0, %s674_s22  ;;  %138 = vperm.xlu0 %639, %v38_v1   ;;  %v39_v4 = vld [vmem:[%s936_s1 + $0x14] sm:$0xf]  ;;  %v41_v5 = vld [vmem:[%s936_s1 + $0x1c] sm:$0xf]  ;;  %v40_v6 = vld [vmem:[%s936_s1 + $0x18] sm:$0xf] }
   0x3   :  { %v43_v7 = vld [vmem:[%s936_s1 + $0x24] sm:$0xf]  ;;  %v42_v8 = vld [vmem:[%s936_s1 + $0x20] sm:$0xf] }
   0x6   :  { %27 = vrot.lane.b32.xlu1 %v22_v3, %s674_s22  ;;  %155 = vperm.xlu0 %639, %v39_v4  }
   0xa   :  { %189 = vperm.xlu1 %640, %v41_v5   ;;  %172 = vperm.xlu0 %639, %v40_v6  }
   0xb   :  { %10 = vsyncpa [#allocation3], 0  ;;  %v45_v9 = vld [vmem:[%s936_s1 + $0x2c] sm:$0xf]  ;;  %v44_v10 = vld [vmem:[%s936_s1 + $0x28] sm:$0xf]  ;;  %v73_v32 = vlaneseq }
   0xc   :  { %v47_v11 = vld [vmem:[%s936_s1 + $0x34] sm:$0xf]  ;;  %v46_v12 = vld [vmem:[%s936_s1 + $0x30] sm:$0xf]  ;;  %v49_v13 = vld [vmem:[%s936_s1 + $0x3c] sm:$0xf] }
   0xd   :  { %v48_v14 = vld [vmem:[%s936_s1 + $0x38] sm:$0xf]  ;;  %v51_v15 = vld [vmem:[%s936_s1 + $0x44] sm:$0xf]  ;;  %v50_v16 = vld [vmem:[%s936_s1 + $0x40] sm:$0xf] }
   0xe   :  { %223 = vperm.xlu1 %640, %v43_v7   ;;  %206 = vperm.xlu0 %639, %v42_v8   ;;  %v53_v17 = vld [vmem:[%s936_s1 + $0x4c] sm:$0xf]  ;;  %v52_v18 = vld [vmem:[%s936_s1 + $0x48] sm:$0xf]  ;;  %v55_v19 = vld [vmem:[%s936_s1 + $0x54] sm:$0xf] }
   0xf   :  { %v54_v20 = vld [vmem:[%s936_s1 + $0x50] sm:$0xf]  ;;  %v57_v21 = vld [vmem:[%s936_s1 + $0x5c] sm:$0xf]  ;;  %v56_v22 = vld [vmem:[%s936_s1 + $0x58] sm:$0xf] }
  0x10   :  { %v59_v23 = vld [vmem:[%s936_s1 + $0x64] sm:$0xf]  ;;  %v58_v24 = vld [vmem:[%s936_s1 + $0x60] sm:$0xf]  ;;  %v61_v25 = vld [vmem:[%s936_s1 + $0x6c] sm:$0xf] }
  0x11   :  { %v60_v26 = vld [vmem:[%s936_s1 + $0x68] sm:$0xf]  ;;  %v62_v27 = vld [vmem:[%s937_s2] sm:$0xf]  ;;  %v35_v30 = vld [vmem:[%s936_s1 + $0x4] sm:$0xf] }
  0x12   :  { %257 = vperm.xlu1 %640, %v45_v9   ;;  %240 = vperm.xlu0 %639, %v44_v10   ;;  %v34_v28 = vld [vmem:[%s936_s1] sm:$0xf]  ;;  %v36_v29 = vld [vmem:[%s936_s1 + $0x8] sm:$0xf]  ;;  %v37_v31 = vld [vmem:[%s936_s1 + $0xc] sm:$0xf] }
  0x13   :  { %v74_v34 = vshrl.u32 %v73_v32, 7  ;;  %vm31_vm0 = vcmask 48128   ;;  %s675_s1 = smov 127   ;;  %s676_s2 = smov 126   ;;  %vm546_vm1 = vcmask 257024  }
  0x14   :  { %s677_s29 = smov 125   ;;  %s678_s30 = smov 124  }
  0x15   :  { %v75_v36 = vsub.s32 0, %v74_v34  ;;  %v92_v39 = vsub.s32 1, %v74_v34  ;;  %v109_v45 = vsub.s32 2, %v74_v34  ;;  %v126_v51 = vsub.s32 3, %v74_v34  ;;  %s679_s6 = smov 123   ;;  %s680_s7 = smov 122  }
  0x16   :  { %291 = vperm.xlu1 %640, %v47_v11   ;;  %274 = vperm.xlu0 %639, %v46_v12   ;;  %s681_s11 = smov [#allocation2]  }
  0x17   :  { %s615_s12 = sshll.u32 %s681_s11, 4  ;;  %s616_s12 = int_to_ptr.vmem [resolvable:$true] %s615_s12 }
  0x18   :  { %p654_p1 = scmp.lt.s32.totalorder %s616_s12, %s616_s12 }
  0x1a   :  { %325 = vperm.xlu1 %640, %v49_v13   ;;  %308 = vperm.xlu0 %639, %v48_v14  }
  0x1e   :  { %359 = vperm.xlu1 %640, %v51_v15   ;;  %342 = vperm.xlu0 %639, %v50_v16  }
  0x22   :  { %393 = vperm.xlu1 %640, %v53_v17   ;;  %376 = vperm.xlu0 %639, %v52_v18  }
  0x26   :  { %427 = vperm.xlu1 %640, %v55_v19   ;;  %410 = vperm.xlu0 %639, %v54_v20  }
  0x2a   :  { %461 = vperm.xlu1 %640, %v57_v21   ;;  %444 = vperm.xlu0 %639, %v56_v22  }
  0x2e   :  { %495 = vperm.xlu1 %640, %v59_v23   ;;  %478 = vperm.xlu0 %639, %v58_v24  }
  0x32   :  { %529 = vperm.xlu1 %640, %v61_v25   ;;  %512 = vperm.xlu0 %639, %v60_v26  }
  0x36   :  { %65 = vperm.xlu1 %640, %v62_v27   ;;  %70 = vperm.xlu0 %639, %v34_v28  }
  0x3a   :  { %104 = vperm.xlu1 %640, %v36_v29   ;;  %87 = vperm.xlu0 %639, %v35_v30  }
  0x3e   :  { %121 = vperm.xlu0 %639, %v37_v31  }
  0x74   :  { %v26_v33 = vpop.permute.xlu1 %25 }
  0x75   :  { %v32_v37 = vsel %vm31_vm0, 0.0, %v26_v33 }
  0x76   :  { %v807_v40 = vrot.slane %v32_v37, %v75_v36  ;;  %v813_v46 = vrot.slane %v32_v37, %v92_v39  ;;  %v819_v52 = vrot.slane %v32_v37, %v109_v45  ;;  %v825_v58 = vrot.slane %v32_v37, %v126_v51 }
  0x78   :  { %v28_v35 = vpop.permute.xlu1 %27 }
  0x79   :  { %v33_v38 = vsel %vm31_vm0, 0.0, %v28_v35 }
  0x7a   :  { %v809_v41 = vrot.slane %v33_v38, %v75_v36  ;;  %v815_v47 = vrot.slane %v33_v38, %v92_v39  ;;  %v821_v53 = vrot.slane %v33_v38, %v109_v45  ;;  %v827_v59 = vrot.slane %v33_v38, %v126_v51 }
  0x81   :  { %v139_v42 = vpop.permute.xlu0 %138 }
  0x82   :  { %v141_v43 = vmul.f32 %v139_v42, %v807_v40  ;;  %v142_v44 = vmul.f32 %v139_v42, %v809_v41 }
  0x84   :  { %145 = vrot.lane.b32.xlu1 %v141_v43, %s675_s1  ;;  %147 = vrot.lane.b32.xlu0 %v142_v44, %s675_s1 }
  0x85   :  { %v156_v48 = vpop.permute.xlu0 %155 }
  0x86   :  { %v158_v49 = vmul.f32 %v156_v48, %v813_v46  ;;  %v159_v50 = vmul.f32 %v156_v48, %v815_v47 }
  0x88   :  { %162 = vrot.lane.b32.xlu1 %v158_v49, %s675_s1  ;;  %164 = vrot.lane.b32.xlu0 %v159_v50, %s675_s1 }
  0x89   :  { %v190_v54 = vpop.permute.xlu1 %189  ;;  %v173_v55 = vpop.permute.xlu0 %172 }
  0x8a   :  { %v175_v56 = vmul.f32 %v173_v55, %v819_v52  ;;  %v176_v57 = vmul.f32 %v173_v55, %v821_v53  ;;  %v192_v62 = vmul.f32 %v190_v54, %v825_v58  ;;  %v193_v63 = vmul.f32 %v190_v54, %v827_v59 }
  0x8c   :  { %179 = vrot.lane.b32.xlu1 %v175_v56, %s675_s1  ;;  %181 = vrot.lane.b32.xlu0 %v176_v57, %s675_s1 }
  0x8d   :  { %v224_v60 = vpop.permute.xlu1 %223  ;;  %v207_v61 = vpop.permute.xlu0 %206 }
  0x8e   :  { %v209_v2 = vmul.f32 %v207_v61, %v807_v40  ;;  %v210_v3 = vmul.f32 %v207_v61, %v809_v41  ;;  %v226_v6 = vmul.f32 %v224_v60, %v813_v46  ;;  %v227_v7 = vmul.f32 %v224_v60, %v815_v47 }
  0x90   :  { %198 = vrot.lane.b32.xlu0 %v193_v63, %s675_s1  ;;  %196 = vrot.lane.b32.xlu1 %v192_v62, %s675_s1 }
  0x91   :  { %v258_v0 = vpop.permute.xlu1 %257  ;;  %v241_v1 = vpop.permute.xlu0 %240 }
  0x92   :  { %v243_v10 = vmul.f32 %v241_v1, %v819_v52  ;;  %v244_v11 = vmul.f32 %v241_v1, %v821_v53  ;;  %v260_v14 = vmul.f32 %v258_v0, %v825_v58  ;;  %v261_v15 = vmul.f32 %v258_v0, %v827_v59 }
  0x94   :  { %215 = vrot.lane.b32.xlu0 %v210_v3, %s676_s2  ;;  %213 = vrot.lane.b32.xlu1 %v209_v2, %s676_s2 }
  0x95   :  { %v292_v4 = vpop.permute.xlu1 %291  ;;  %v275_v5 = vpop.permute.xlu0 %274 }
  0x96   :  { %v277_v18 = vmul.f32 %v275_v5, %v807_v40  ;;  %v278_v19 = vmul.f32 %v275_v5, %v809_v41  ;;  %v294_v22 = vmul.f32 %v292_v4, %v813_v46  ;;  %v295_v23 = vmul.f32 %v292_v4, %v815_v47 }
  0x98   :  { %232 = vrot.lane.b32.xlu0 %v227_v7, %s676_s2  ;;  %230 = vrot.lane.b32.xlu1 %v226_v6, %s676_s2 }
  0x99   :  { %v326_v8 = vpop.permute.xlu1 %325  ;;  %v309_v9 = vpop.permute.xlu0 %308 }
  0x9a   :  { %v311_v26 = vmul.f32 %v309_v9, %v819_v52  ;;  %v312_v27 = vmul.f32 %v309_v9, %v821_v53  ;;  %v328_v30 = vmul.f32 %v326_v8, %v825_v58  ;;  %v329_v31 = vmul.f32 %v326_v8, %v827_v59 }
  0x9c   :  { %249 = vrot.lane.b32.xlu0 %v244_v11, %s676_s2  ;;  %247 = vrot.lane.b32.xlu1 %v243_v10, %s676_s2 }
  0x9d   :  { %v360_v12 = vpop.permute.xlu1 %359  ;;  %v343_v13 = vpop.permute.xlu0 %342 }
  0x9e   :  { %v345_v34 = vmul.f32 %v343_v13, %v807_v40  ;;  %v346_v35 = vmul.f32 %v343_v13, %v809_v41  ;;  %v362_v38 = vmul.f32 %v360_v12, %v813_v46  ;;  %v363_v39 = vmul.f32 %v360_v12, %v815_v47 }
  0xa0   :  { %266 = vrot.lane.b32.xlu0 %v261_v15, %s676_s2  ;;  %264 = vrot.lane.b32.xlu1 %v260_v14, %s676_s2 }
  0xa1   :  { %v394_v16 = vpop.permute.xlu1 %393  ;;  %v377_v17 = vpop.permute.xlu0 %376 }
  0xa2   :  { %v379_v45 = vmul.f32 %v377_v17, %v819_v52  ;;  %v380_v48 = vmul.f32 %v377_v17, %v821_v53  ;;  %v396_v62 = vmul.f32 %v394_v16, %v825_v58  ;;  %v397_v63 = vmul.f32 %v394_v16, %v827_v59 }
  0xa4   :  { %283 = vrot.lane.b32.xlu0 %v278_v19, %s677_s29  ;;  %281 = vrot.lane.b32.xlu1 %v277_v18, %s677_s29 }
  0xa5   :  { %v841_v20 = vpop.permute.xlu1 %427  ;;  %v411_v21 = vpop.permute.xlu0 %410 }
  0xa6   :  { %v413_v7 = vmul.f32 %v411_v21, %v807_v40  ;;  %v414_v8 = vmul.f32 %v411_v21, %v809_v41  ;;  %v430_v9 = vmul.f32 %v841_v20, %v813_v46  ;;  %v431_v10 = vmul.f32 %v841_v20, %v815_v47 }
  0xa8   :  { %300 = vrot.lane.b32.xlu0 %v295_v23, %s677_s29  ;;  %298 = vrot.lane.b32.xlu1 %v294_v22, %s677_s29 }
  0xa9   :  { %v845_v24 = vpop.permute.xlu1 %461  ;;  %v445_v25 = vpop.permute.xlu0 %444 }
  0xaa   :  { %v447_v11 = vmul.f32 %v445_v25, %v819_v52  ;;  %v448_v12 = vmul.f32 %v445_v25, %v821_v53  ;;  %v464_v13 = vmul.f32 %v845_v24, %v825_v58  ;;  %v465_v14 = vmul.f32 %v845_v24, %v827_v59 }
  0xac   :  { %317 = vrot.lane.b32.xlu0 %v312_v27, %s677_s29  ;;  %315 = vrot.lane.b32.xlu1 %v311_v26, %s677_s29 }
  0xad   :  { %v849_v28 = vpop.permute.xlu1 %495  ;;  %v851_v29 = vpop.permute.xlu0 %478 }
  0xae   :  { %v481_v15 = vmul.f32 %v851_v29, %v807_v40  ;;  %v482_v16 = vmul.f32 %v851_v29, %v809_v41  ;;  %v498_v17 = vmul.f32 %v849_v28, %v813_v46  ;;  %v499_v18 = vmul.f32 %v849_v28, %v815_v47 }
  0xb0   :  { %334 = vrot.lane.b32.xlu0 %v329_v31, %s677_s29  ;;  %332 = vrot.lane.b32.xlu1 %v328_v30, %s677_s29 }
  0xb1   :  { %v855_v32 = vpop.permute.xlu1 %529  ;;  %v857_v33 = vpop.permute.xlu0 %512 }
  0xb2   :  { %v515_v19 = vmul.f32 %v857_v33, %v819_v52  ;;  %v533_v20 = vmul.f32 %v855_v32, %v827_v59 }
  0xb4   :  { %351 = vrot.lane.b32.xlu0 %v346_v35, %s678_s30  ;;  %349 = vrot.lane.b32.xlu1 %v345_v34, %s678_s30 }
  0xb5   :  { %v66_v36 = vpop.permute.xlu1 %65  ;;  %v71_v37 = vpop.permute.xlu0 %70 }
  0xb6   :  { %v81_v42 = vmul.f32 %v807_v40, %v71_v37  ;;  %v82_v43 = vmul.f32 %v809_v41, %v71_v37  ;;  %v516_v40 = vmul.f32 %v857_v33, %v821_v53  ;;  %v532_v41 = vmul.f32 %v855_v32, %v825_v58 }
  0xb8   :  { %368 = vrot.lane.b32.xlu0 %v363_v39, %s678_s30  ;;  %366 = vrot.lane.b32.xlu1 %v362_v38, %s678_s30  ;;  %v83_v50 = vadd.f32 %v81_v42, %v66_v36  ;;  %v84_v51 = vadd.f32 %v82_v43, %v66_v36 }
  0xb9   :  { %v105_v44 = vpop.permute.xlu1 %104  ;;  %v88_v49 = vpop.permute.xlu0 %87 }
  0xba   :  { %v98_v54 = vmul.f32 %v813_v46, %v88_v49  ;;  %v99_v55 = vmul.f32 %v815_v47, %v88_v49  ;;  %v115_v56 = vmul.f32 %v819_v52, %v105_v44  ;;  %v116_v57 = vmul.f32 %v821_v53, %v105_v44 }
  0xbc   :  { %v100_v60 = vadd.f32 %v98_v54, %v83_v50  ;;  %v101_v61 = vadd.f32 %v99_v55, %v84_v51  ;;  %385 = vrot.lane.b32.xlu0 %v380_v48, %s678_s30  ;;  %383 = vrot.lane.b32.xlu1 %v379_v45, %s678_s30 }
  0xbd   :  { %v122_v0 = vpop.permute.xlu0 %121 }
  0xbe   :  { %v132_v1 = vmul.f32 %v825_v58, %v122_v0  ;;  %v133_v2 = vmul.f32 %v827_v59, %v122_v0  ;;  %v118_v3 = vadd.f32 %v116_v57, %v101_v61  ;;  %v117_v4 = vadd.f32 %v115_v56, %v100_v60 }
  0xc0   :  { %402 = vrot.lane.b32.xlu0 %v397_v63, %s678_s30  ;;  %400 = vrot.lane.b32.xlu1 %v396_v62, %s678_s30  ;;  %v135_v5 = vadd.f32 %v133_v2, %v118_v3  ;;  %v134_v6 = vadd.f32 %v132_v1, %v117_v4 }
  0xc4   :  { %419 = vrot.lane.b32.xlu0 %v414_v8, %s679_s6  ;;  %417 = vrot.lane.b32.xlu1 %v413_v7, %s679_s6 }
  0xc8   :  { %436 = vrot.lane.b32.xlu0 %v431_v10, %s679_s6  ;;  %434 = vrot.lane.b32.xlu1 %v430_v9, %s679_s6 }
  0xcc   :  { %453 = vrot.lane.b32.xlu0 %v448_v12, %s679_s6  ;;  %451 = vrot.lane.b32.xlu1 %v447_v11, %s679_s6 }
  0xd0   :  { %470 = vrot.lane.b32.xlu0 %v465_v14, %s679_s6  ;;  %468 = vrot.lane.b32.xlu1 %v464_v13, %s679_s6 }
  0xd4   :  { %487 = vrot.lane.b32.xlu0 %v482_v16, %s680_s7  ;;  %485 = vrot.lane.b32.xlu1 %v481_v15, %s680_s7 }
  0xd8   :  { %504 = vrot.lane.b32.xlu0 %v499_v18, %s680_s7  ;;  %502 = vrot.lane.b32.xlu1 %v498_v17, %s680_s7 }
  0xdc   :  { %521 = vrot.lane.b32.xlu0 %v516_v40, %s680_s7  ;;  %519 = vrot.lane.b32.xlu1 %v515_v19, %s680_s7 }
  0xe0   :  { %538 = vrot.lane.b32.xlu0 %v533_v20, %s680_s7  ;;  %536 = vrot.lane.b32.xlu1 %v532_v41, %s680_s7 }
  0xf6   :  { %v148_v46 = vpop.permute.xlu0 %147  ;;  %v146_v47 = vpop.permute.xlu1 %145 }
  0xf7   :  { %v152_v39 = vadd.f32 %v148_v46, %v135_v5  ;;  %v151_v42 = vadd.f32 %v146_v47, %v134_v6 }
  0xfa   :  { %v165_v21 = vpop.permute.xlu0 %164  ;;  %v163_v22 = vpop.permute.xlu1 %162 }
  0xfb   :  { %v169_v45 = vadd.f32 %v165_v21, %v152_v39  ;;  %v168_v48 = vadd.f32 %v163_v22, %v151_v42 }
  0xfe   :  { %v182_v23 = vpop.permute.xlu0 %181  ;;  %v180_v24 = vpop.permute.xlu1 %179 }
  0xff   :  { %v186_v49 = vadd.f32 %v182_v23, %v169_v45  ;;  %v185_v50 = vadd.f32 %v180_v24, %v168_v48 }
 0x102   :  { %v199_v52 = vpop.permute.xlu0 %198  ;;  %v197_v25 = vpop.permute.xlu1 %196 }
 0x103   :  { %v203_v55 = vadd.f32 %v199_v52, %v186_v49  ;;  %v202_v56 = vadd.f32 %v197_v25, %v185_v50 }
 0x106   :  { %v216_v26 = vpop.permute.xlu0 %215  ;;  %v214_v53 = vpop.permute.xlu1 %213 }
 0x107   :  { %v220_v57 = vadd.f32 %v216_v26, %v203_v55  ;;  %v219_v60 = vadd.f32 %v214_v53, %v202_v56 }
 0x10a   :  { %v233_v27 = vpop.permute.xlu0 %232  ;;  %v231_v28 = vpop.permute.xlu1 %230 }
 0x10b   :  { %v237_v63 = vadd.f32 %v233_v27, %v220_v57  ;;  %v236_v0 = vadd.f32 %v231_v28, %v219_v60 }
 0x10e   :  { %v250_v29 = vpop.permute.xlu0 %249  ;;  %v248_v30 = vpop.permute.xlu1 %247 }
 0x10f   :  { %v254_v1 = vadd.f32 %v250_v29, %v237_v63  ;;  %v253_v2 = vadd.f32 %v248_v30, %v236_v0 }
 0x112   :  { %v267_v58 = vpop.permute.xlu0 %266  ;;  %v265_v31 = vpop.permute.xlu1 %264 }
 0x113   :  { %v271_v5 = vadd.f32 %v267_v58, %v254_v1  ;;  %v270_v6 = vadd.f32 %v265_v31, %v253_v2 }
 0x116   :  { %v284_v33 = vpop.permute.xlu0 %283  ;;  %v282_v59 = vpop.permute.xlu1 %281 }
 0x117   :  { %v288_v7 = vadd.f32 %v284_v33, %v271_v5  ;;  %v287_v8 = vadd.f32 %v282_v59, %v270_v6 }
 0x11a   :  { %v301_v32 = vpop.permute.xlu0 %300  ;;  %v299_v34 = vpop.permute.xlu1 %298 }
 0x11b   :  { %v305_v11 = vadd.f32 %v301_v32, %v288_v7  ;;  %v304_v12 = vadd.f32 %v299_v34, %v287_v8 }
 0x11e   :  { %v318_v35 = vpop.permute.xlu0 %317  ;;  %v316_v36 = vpop.permute.xlu1 %315 }
 0x11f   :  { %v322_v13 = vadd.f32 %v318_v35, %v305_v11  ;;  %v321_v14 = vadd.f32 %v316_v36, %v304_v12 }
 0x122   :  { %v335_v37 = vpop.permute.xlu0 %334  ;;  %v333_v38 = vpop.permute.xlu1 %332 }
 0x123   :  { %v339_v17 = vadd.f32 %v335_v37, %v322_v13  ;;  %v338_v18 = vadd.f32 %v333_v38, %v321_v14 }
 0x126   :  { %v352_v43 = vpop.permute.xlu0 %351  ;;  %v350_v44 = vpop.permute.xlu1 %349 }
 0x127   :  { %v356_v19 = vadd.f32 %v352_v43, %v339_v17  ;;  %v355_v40 = vadd.f32 %v350_v44, %v338_v18 }
 0x12a   :  { %v369_v51 = vpop.permute.xlu0 %368  ;;  %v367_v54 = vpop.permute.xlu1 %366 }
 0x12b   :  { %v373_v46 = vadd.f32 %v369_v51, %v356_v19  ;;  %v372_v47 = vadd.f32 %v367_v54, %v355_v40 }
 0x12e   :  { %v386_v61 = vpop.permute.xlu0 %385  ;;  %v384_v62 = vpop.permute.xlu1 %383 }
 0x12f   :  { %v390_v21 = vadd.f32 %v386_v61, %v373_v46  ;;  %v389_v22 = vadd.f32 %v384_v62, %v372_v47 }
 0x132   :  { %v403_v3 = vpop.permute.xlu0 %402  ;;  %v401_v4 = vpop.permute.xlu1 %400 }
 0x133   :  { %v407_v52 = vadd.f32 %v403_v3, %v390_v21  ;;  %v406_v25 = vadd.f32 %v401_v4, %v389_v22  ;;  %v627_v22 = vld [vmem:[%s939_s4] ss:$0 sm:$0xff] }
 0x136   :  { %v420_v9 = vpop.permute.xlu0 %419  ;;  %v418_v10 = vpop.permute.xlu1 %417 }
 0x137   :  { %v424_v26 = vadd.f32 %v420_v9, %v407_v52  ;;  %v423_v53 = vadd.f32 %v418_v10, %v406_v25 }
 0x13a   :  { %v437_v15 = vpop.permute.xlu0 %436  ;;  %v435_v16 = vpop.permute.xlu1 %434 }
 0x13b   :  { %v441_v29 = vadd.f32 %v437_v15, %v424_v26  ;;  %v440_v30 = vadd.f32 %v435_v16, %v423_v53 }
 0x13e   :  { %v454_v41 = vpop.permute.xlu0 %453  ;;  %v452_v20 = vpop.permute.xlu1 %451 }
 0x13f   :  { %v458_v58 = vadd.f32 %v454_v41, %v441_v29  ;;  %v457_v31 = vadd.f32 %v452_v20, %v440_v30  ;;  %v626_v20 = vld [vmem:[%s938_s3] ss:$0 sm:$0xff]  ;;  %s649_s3 = scalar_lea.vmem %s616_s12, 128 }
 0x140   :  { %p650_p0 = scmp.ne.s32.totalorder %s616_s12, %s649_s3  ;;  %p655_p2 = scmp.lt.s32.totalorder %s649_s3, %s649_s3 }
 0x142   :  { %v471_v23 = vpop.permute.xlu0 %470  ;;  %v469_v24 = vpop.permute.xlu1 %468  ;;  %p656_p3 = por %p655_p2, %p654_p1 }
 0x143   :  { %v475_v32 = vadd.f32 %v471_v23, %v458_v58  ;;  %v474_v34 = vadd.f32 %v469_v24, %v457_v31 }
 0x144   :  { %p657_p4 = pnand %p656_p3, %p650_p0 }
 0x146   :  { %v488_v27 = vpop.permute.xlu0 %487  ;;  %v486_v28 = vpop.permute.xlu1 %485 }
 0x147   :  { %v492_v35 = vadd.f32 %v488_v27, %v475_v32  ;;  %v491_v36 = vadd.f32 %v486_v28, %v474_v34 }
 0x14a   :  { %v505_v33 = vpop.permute.xlu0 %504  ;;  %v503_v59 = vpop.permute.xlu1 %502 }
 0x14b   :  { %v509_v39 = vadd.f32 %v505_v33, %v492_v35  ;;  %v508_v42 = vadd.f32 %v503_v59, %v491_v36 }
 0x14e   :  { %v522_v37 = vpop.permute.xlu0 %521  ;;  %v520_v38 = vpop.permute.xlu1 %519 }
 0x14f   :  { %v526_v43 = vadd.f32 %v522_v37, %v509_v39  ;;  %v525_v44 = vadd.f32 %v520_v38, %v508_v42 }
 0x152   :  { %v539_v45 = vpop.permute.xlu0 %538  ;;  %v537_v48 = vpop.permute.xlu1 %536 }
 0x153   :  { %v543_v49 = vadd.f32 %v539_v45, %v526_v43  ;;  %v542_v50 = vadd.f32 %v537_v48, %v525_v44 }
 0x155   :  { %v545_v51 = vadd.f32 %v543_v49, %v543_v49  ;;  %v544_v54 = vadd.f32 %v542_v50, %v542_v50 }
 0x157   :  { %v550_v55 = vsel %vm546_vm1, %v545_v51, 0.0  ;;  %v547_v56 = vsel %vm546_vm1, %v544_v54, 0.0 }
 0x158   :  { %551 = vadd.xlane.f32.xlu0 %v550_v55  ;;  %548 = vadd.xlane.f32.xlu1 %v547_v56 }
 0x1e5   :  { %v552_v57 = vpop.xlane.xlu0 %551  ;;  %v549_v60 = vpop.xlane.xlu1 %548 }
 0x1e6   :  { %v555_v61 = vmul.f32 0.03125, %v552_v57  ;;  %v554_v62 = vmul.f32 0.03125, %v549_v60 }
 0x1e8   :  { %v557_v63 = vsub.f32 %v545_v51, %v555_v61  ;;  %v556_v0 = vsub.f32 %v544_v54, %v554_v62 }
 0x1ea   :  { %v559_v1 = vmul.f32 %v557_v63, %v557_v63  ;;  %v558_v2 = vmul.f32 %v556_v0, %v556_v0 }
 0x1ec   :  { %v563_v3 = vsel %vm546_vm1, %v559_v1, 0.0  ;;  %v560_v4 = vsel %vm546_vm1, %v558_v2, 0.0 }
 0x1ed   :  { %564 = vadd.xlane.f32.xlu1 %v563_v3  ;;  %561 = vadd.xlane.f32.xlu0 %v560_v4 }
 0x27a   :  { %v562_v5 = vpop.xlane.xlu0 %561  ;;  %v565_v6 = vpop.xlane.xlu1 %564 }
 0x27b   :  { %v566_v7 = vmul.f32 0.032258064, %v562_v5  ;;  %v567_v8 = vmul.f32 0.032258064, %v565_v6 }
 0x27d   :  { %641 = vrsqrt.f32 %v566_v7  ;;  %vm570_vm2 = vcmp.eq.f32.partialorder %v566_v7, inf  ;;  %v573_v12 = vand.u32 2147483648, %v566_v7  ;;  %vm572_vm3 = vcmp.eq.f32.partialorder %v566_v7, 0.0 }
 0x27e   :  { %643 = vrsqrt.f32 %v567_v8  ;;  %vm577_vm4 = vcmp.eq.f32.partialorder %v567_v8, inf  ;;  %v580_v15 = vand.u32 2147483648, %v567_v8  ;;  %vm579_vm5 = vcmp.eq.f32.partialorder %v567_v8, 0.0 }
 0x287   :  { %v642_v9 = vpop.eup %641 }
 0x288   :  { %v644_v10 = vpop.eup %643  ;;  %v569_v11 = vmul.f32 %v642_v9, %v566_v7 }
 0x289   :  { %v576_v13 = vmul.f32 %v644_v10, %v567_v8 }
 0x28a   :  { %v571_v14 = vsel %vm570_vm2, %v566_v7, %v569_v11 }
 0x28b   :  { %v574_v16 = vsel %vm572_vm3, %v573_v12, %v571_v14  ;;  %v578_v17 = vsel %vm577_vm4, %v567_v8, %v576_v13 }
 0x28c   :  { %v583_v18 = vadd.f32 1e-06, %v574_v16  ;;  %v581_v19 = vsel %vm579_vm5, %v580_v15, %v578_v17 }
 0x28d   :  { %v584_v40 = vadd.f32 1e-06, %v581_v19 }
 0x28e   :  { %645 = vrcp.f32 %v583_v18 }
 0x28f   :  { %647 = vrcp.f32 %v584_v40 }
 0x298   :  { %v646_v41 = vpop.eup %645 }
 0x299   :  { %v648_v46 = vpop.eup %647  ;;  %v586_v47 = vmul.f32 %v646_v41, %v556_v0 }
 0x29a   :  { %v588_v21 = vmul.f32 %v648_v46, %v557_v63 }
 0x29b   :  { %v595_v23 = vmul.f32 %v626_v20, %v586_v47 }
 0x29c   :  { %v596_v24 = vmul.f32 %v626_v20, %v588_v21 }
 0x29d   :  { %v604_v52 = vadd.f32 %v627_v22, %v595_v23 }
 0x29e   :  { %v605_v25 = vadd.f32 %v627_v22, %v596_v24 }
 0x29f   :  { %v606_v26 = vadd.f32 %v604_v52, %v544_v54 }
 0x2a0   :  { %v607_v53 = vadd.f32 %v605_v25, %v545_v51 }
 0x2a1   :  { %608 = vst.msk [vmem:[#allocation2] sm:$0xf] %vm546_vm1, %v606_v26 }
 0x2a2   :  { %609 = vst.msk [vmem:[#allocation2 + $0x4] sm:$0xf] %vm546_vm1, %v607_v53 }
 0x2a3   :  { %660 = shalt.err (!%p657_p4)
}
 0x2a4   :  { %s661_s14 = scalar_lea.hbm %s940_s5, 128 }
 0x2a5   :  { %p662_p5 = scmp.ne.s32.totalorder %s940_s5, %s661_s14  ;;  %p665_p6 = scmp.lt.u32.totalorder %s661_s14, %s940_s5 }
 0x2a7   :  { %p667_p7 = pnand %p665_p6, %p662_p5 }
 0x2a9   :  { %670 = shalt.err (!%p667_p7)
}
 0x2aa   :  { %s682_s19 = smov 64   ;;  %s683_s20 = smov 4  }
 0x2ab   :  { %621 = dma.vmem_to_hbm [thread:$0]  %s616_s12, 128, %s940_s5, [#allocation3], %s682_s19, %s682_s19, %s683_s20  }
 0x2ac   :  { %671 = dma.done.wait [#allocation3], 128  }
 0x2ad   :  { %672 = vsyncadd [#allocation3], 4294967168 }
 0x2ae   :  { %625 = vsyncpa [#allocation3], 1 }

</bundles_post_ra>
